<compile_context>
chip_gen: v5e
topology: v5e:2x2
jax: 0.10.0
libtpu: 0.0.40
codegen_flags: <defaults>
</compile_context>

<pallas_src>
import numpy as np
import jax
import jax.numpy as jnp
from jax.experimental import pallas as pl
from jax.experimental.pallas import tpu as pltpu

PI = float(np.pi)
S_COSINE = 0.008  # module's self.s


# ----------------------------- schedule ---------------------------------------

def _cosine_schedule_coefs(n_timesteps):
    """Per-reverse-step coefficients, matching TokenDiffusion.reverse_diffusion."""
    t_grid = np.linspace(0.0, 1.0, n_timesteps + 1)
    alphabars = np.cos(((t_grid + S_COSINE) / (1.0 + S_COSINE)) * PI / 2.0) ** 2
    alphabars[-1] = 1e-5
    alphas = alphabars[1:] / alphabars[:-1]
    betas = 1.0 - alphas
    sigmas = np.sqrt(betas * (1.0 - alphabars[:-1]) / (1.0 - alphabars[1:]))

    coefs = np.zeros((n_timesteps, 4), dtype=np.float32)
    for s in range(n_timesteps):
        t = n_timesteps - s                       # loop: t = n, n-1, ..., 1
        coefs[s, 0] = 1.0 / np.sqrt(alphas[t - 1])
        coefs[s, 1] = betas[t - 1] / np.sqrt(1.0 - alphabars[t])
        coefs[s, 2] = sigmas[t - 1] if t > 1 else 0.0
        coefs[s, 3] = t / n_timesteps
    return coefs


# ----------------------------- Pallas kernel ---------------------------------

def reverse_step_kernel(coef_ref, xt0_ref, mask_ref, noise_ref,
                        w1t_ref, w2t_ref, cond_ref, wt_ref, b2_ref,
                        xt_ref):
    """One reverse-diffusion step for one batch element.

    Per-batch views (T on the lane axis):
      xt_ref, xt0_ref, noise_ref : (C, T)      (noise is bf16)
      mask_ref                   : (1, T)
      w1t_ref                    : (2H, C)     fused first-layer weight (transposed)
      w2t_ref                    : (C, 2H)     fused second-layer weight (transposed)
      cond_ref                   : (2H, 1)     token@wg + b1 (both estimators, hoisted)
      wt_ref                     : (2H, 1)     time-conditioning weight (fused)
      b2_ref                     : (C, 1)      summed output bias
      coef_ref                   : flat 1-D SMEM, 4 scalars per step
    """
    step = pl.program_id(1)

    # Carried state: initialize the resident output block from xt0 = z * mask.
    @pl.when(step == 0)
    def _():
        xt_ref[...] = xt0_ref[...]

    base = 4 * step
    inv_sqrt_alpha = coef_ref[base + 0]   # 1 / sqrt(alpha_t)
    coef_eps       = coef_ref[base + 1]   # beta_t / sqrt(1 - alphabar_t)
    sigma_t        = coef_ref[base + 2]   # 0 on the final step (t == 1)
    t_cont         = coef_ref[base + 3]   # t / n_timesteps

    x = xt_ref[...]                                                      # (C, T)

    # Fused score estimators: one matmul pair on the MXU.
    h = jnp.dot(w1t_ref[...], x, preferred_element_type=jnp.float32)    # (2H, T)
    h = jnp.tanh(h + cond_ref[...] + t_cont * wt_ref[...])
    eps = jnp.dot(w2t_ref[...], h, preferred_element_type=jnp.float32)  # (C, T)
    eps = eps + b2_ref[...]

    # Reverse update (eps mask dropped: the final mask multiply makes it redundant).
    mu = (x - coef_eps * eps) * inv_sqrt_alpha
    xt_ref[...] = (mu + sigma_t * noise_ref[...].astype(jnp.float32)) * mask_ref[...]


# ------------------------------ wrapper ---------------------------------------

def token_diffusion_reverse(z, mask, src_tkn, ftr_tkn, n_timesteps, params, noise_bf16):
    """z: (B, C, T); mask: (B, 1, T); tokens: (B, G); noise_bf16: (n_timesteps, B, C, T)."""
    B, C, T = z.shape
    (s_w1, s_b1, s_wg, s_wt, s_w2, s_b2,
     f_w1, f_b1, f_wg, f_wt, f_w2, f_b2) = params
    H = s_w1.shape[1]
    H2 = 2 * H
    f32 = jnp.float32

    # ---- hoisted, step-invariant preprocessing (one fused XLA region) ----
    w1t  = jnp.concatenate([s_w1, f_w1], axis=1).T.astype(f32)          # (2H, C)
    w2t  = jnp.concatenate([s_w2, f_w2], axis=0).T.astype(f32)          # (C, 2H)
    cond = jnp.concatenate([src_tkn @ s_wg + s_b1,
                            ftr_tkn @ f_wg + f_b1], axis=1)             # (B, 2H)
    cond = cond.astype(f32)[..., None]                                  # (B, 2H, 1)
    wtc  = jnp.concatenate([s_wt, f_wt], axis=1).reshape(H2, 1).astype(f32)
    b2c  = (s_b2 + f_b2).reshape(C, 1).astype(f32)

    mask_f = mask.astype(f32)
    xt0 = z.astype(f32) * mask_f                                        # (B, C, T)
    coefs = jnp.asarray(_cosine_schedule_coefs(n_timesteps).reshape(-1))  # 1-D SMEM

    in_specs = [
        pl.BlockSpec(memory_space=pltpu.MemorySpace.SMEM),                     # coefs (flat)
        pl.BlockSpec((None, C, T),       lambda b, s: (b, 0, 0)),              # xt0 (per batch)
        pl.BlockSpec((None, 1, T),       lambda b, s: (b, 0, 0)),              # mask (B,1,T)
        pl.BlockSpec((None, None, C, T), lambda b, s: (s, b, 0, 0)),           # per-step noise
        pl.BlockSpec((H2, C),            lambda b, s: (0, 0)),                 # w1t (fused)
        pl.BlockSpec((C, H2),            lambda b, s: (0, 0)),                 # w2t (fused)
        pl.BlockSpec((None, H2, 1),      lambda b, s: (b, 0, 0)),              # token/b1 cond
        pl.BlockSpec((H2, 1),            lambda b, s: (0, 0)),                 # wt (fused)
        pl.BlockSpec((C, 1),             lambda b, s: (0, 0)),                 # b2 sum
    ]

    out = pl.pallas_call(
        reverse_step_kernel,
        out_shape=jax.ShapeDtypeStruct((B, C, T), f32),
        grid_spec=pltpu.PrefetchScalarGridSpec(
            num_scalar_prefetch=0,
            grid=(B, n_timesteps),                                      # timesteps last (sequential)
            in_specs=in_specs,
            out_specs=pl.BlockSpec((None, C, T), lambda b, s: (b, 0, 0)),
        ),
        compiler_params=pltpu.CompilerParams(
            dimension_semantics=("parallel", "arbitrary")),
    )(coefs, xt0, mask_f, noise_bf16, w1t, w2t, cond, wtc, b2c)

    return out                                                           # (B, C, T)


# --------------------------- pure-JAX reference --------------------------------

def _reference(z, mask, src_tkn, ftr_tkn, n_timesteps, params, noise_f32):
    (s_w1, s_b1, s_wg, s_wt, s_w2, s_b2,
     f_w1, f_b1, f_wg, f_wt, f_w2, f_b2) = params
    coefs = _cosine_schedule_coefs(n_timesteps)

    def est(x, w1, b1, wg, wt, w2, b2, tkn, t_cont):
        # x: (B, C, T)
        h = jnp.einsum('bct,ch->bht', x, w1)
        h = h + b1.reshape(1, -1, 1) + t_cont * wt.reshape(1, -1, 1)
        h = h + jnp.dot(tkn, wg)[:, :, None]
        h = jnp.tanh(h)
        return jnp.einsum('bht,hc->bct', h, w2) + b2.reshape(1, -1, 1)

    m = mask
    xt = z * m
    for s in range(n_timesteps):
        ia, ce, sg, tc = [float(v) for v in coefs[s]]
        eps = est(xt, s_w1, s_b1, s_wg, s_wt, s_w2, s_b2, src_tkn, tc)
        eps = eps + est(xt, f_w1, f_b1, f_wg, f_wt, f_w2, f_b2, ftr_tkn, tc)
        eps = eps * m
        mu = (xt - ce * eps) * ia
        xt = (mu + sg * noise_f32[s]) * m
    return xt


# --------------------------------- main ----------------------------------------

if __name__ == "__main__":
    B, C, T = 2, 8, 128         # batch, in_dim (n_feats), sequence length (lane-dense)
    H, G = 32, 16               # dec_dim, gin_channels
    n_timesteps = 8

    root = jax.random.PRNGKey(0)
    keys = jax.random.split(root, 16)

    z = jax.random.normal(keys[0], (B, C, T), dtype=jnp.float32)
    lengths = jnp.array([T, T - 40], dtype=jnp.int32)
    mask = (jnp.arange(T)[None, :] < lengths[:, None]).astype(jnp.float32)[:, None, :]  # (B,1,T)
    src_tkn = jax.random.normal(keys[1], (B, G), dtype=jnp.float32)
    ftr_tkn = jax.random.normal(keys[2], (B, G), dtype=jnp.float32)

    def p(k, shape):
        return 0.1 * jax.random.normal(k, shape, dtype=jnp.float32)

    params = (
        p(keys[3], (C, H)), p(keys[4], (1, H)), p(keys[5], (G, H)),
        p(keys[6], (1, H)), p(keys[7], (H, C)), p(keys[8], (1, C)),
        p(keys[9], (C, H)), p(keys[10], (1, H)), p(keys[11], (G, H)),
        p(keys[12], (1, H)), p(keys[13], (H, C)), p(keys[14], (1, C)),
    )

    # pre-drawn reverse-process noise (torch.randn_like equivalent), streamed as bf16
    noise_f32 = jax.random.normal(keys[15], (n_timesteps, B, C, T), dtype=jnp.float32)
    noise_bf16 = noise_f32.astype(jnp.bfloat16)

    run = jax.jit(token_diffusion_reverse, static_argnums=(4,))
    out = jax.block_until_ready(run(z, mask, src_tkn, ftr_tkn, n_timesteps, params, noise_bf16))

    ref = jax.block_until_ready(
        _reference(z, mask, src_tkn, ftr_tkn, n_timesteps, params,
                   noise_bf16.astype(jnp.float32)))

    assert out.shape == (B, C, T)
    assert bool(jnp.all(jnp.isfinite(out)))
    np.testing.assert_allclose(np.asarray(out), np.asarray(ref), rtol=5e-3, atol=5e-2)

    print("KERNEL_OK")
</pallas_src>

<mosaic_0001>
module attributes {stable_mosaic.version = 11 : i64} {
  func.func @reverse_step_kernel(%arg0: i32, %arg1: i32, %arg2: memref<32xf32, #tpu.memory_space<smem>>, %arg3: memref<1x8x128xf32, #tpu.memory_space<vmem>>, %arg4: memref<1x1x128xf32, #tpu.memory_space<vmem>>, %arg5: memref<1x1x8x128xbf16, #tpu.memory_space<vmem>>, %arg6: memref<64x8xf32, #tpu.memory_space<vmem>>, %arg7: memref<8x64xf32, #tpu.memory_space<vmem>>, %arg8: memref<1x64x1xf32, #tpu.memory_space<vmem>>, %arg9: memref<64x1xf32, #tpu.memory_space<vmem>>, %arg10: memref<8x1xf32, #tpu.memory_space<vmem>>, %arg11: memref<1x8x128xf32, #tpu.memory_space<vmem>>) attributes {dimension_semantics = [#tpu.dimension_semantics<parallel>, #tpu.dimension_semantics<arbitrary>], iteration_bounds = array<i64: 2, 8>, scalar_prefetch = 0 : i64, scratch_operands = 0 : i64, tpu.core_type = #tpu.core_type<tc>, window_params = [{transform_indices = @transform_0, window_bounds = array<i64: 32>}, {transform_indices = @transform_1, window_bounds = array<i64: 1, 8, 128>}, {transform_indices = @transform_2, window_bounds = array<i64: 1, 1, 128>}, {transform_indices = @transform_3, window_bounds = array<i64: 1, 1, 8, 128>}, {pipeline_mode = #tpu.pipeline_mode<synchronous>, transform_indices = @transform_4, window_bounds = array<i64: 64, 8>}, {pipeline_mode = #tpu.pipeline_mode<synchronous>, transform_indices = @transform_5, window_bounds = array<i64: 8, 64>}, {transform_indices = @transform_6, window_bounds = array<i64: 1, 64, 1>}, {pipeline_mode = #tpu.pipeline_mode<synchronous>, transform_indices = @transform_7, window_bounds = array<i64: 64, 1>}, {pipeline_mode = #tpu.pipeline_mode<synchronous>, transform_indices = @transform_8, window_bounds = array<i64: 8, 1>}, {transform_indices = @transform_9, window_bounds = array<i64: 1, 8, 128>}]} {
    %c0_i32 = arith.constant 0 : i32
    %0 = arith.cmpi eq, %arg1, %c0_i32 : i32
    %1 = arith.extui %0 : i1 to i32
    %c0_i32_0 = arith.constant 0 : i32
    %2 = arith.cmpi ne, %1, %c0_i32_0 : i32
    scf.if %2 {
      %c0_26 = arith.constant 0 : index
      %c0_27 = arith.constant 0 : index
      %c0_28 = arith.constant 0 : index
      %53 = vector.load %arg3[%c0_26, %c0_27, %c0_28] : memref<1x8x128xf32, #tpu.memory_space<vmem>>, vector<1x8x128xf32>
      %54 = vector.shape_cast %53 : vector<1x8x128xf32> to vector<8x128xf32>
      %c0_29 = arith.constant 0 : index
      %c0_30 = arith.constant 0 : index
      %c0_31 = arith.constant 0 : index
      %55 = vector.load %arg11[%c0_29, %c0_30, %c0_31] : memref<1x8x128xf32, #tpu.memory_space<vmem>>, vector<1x8x128xf32>
      %56 = vector.shape_cast %55 : vector<1x8x128xf32> to vector<8x128xf32>
      %57 = vector.shape_cast %54 : vector<8x128xf32> to vector<1x8x128xf32>
      tpu.vector_store %arg11[%c0_29, %c0_30, %c0_31], %57 {strides = array<i32>} : memref<1x8x128xf32, #tpu.memory_space<vmem>>, vector<1x8x128xf32>,
    } else {
    }
    %c4_i32 = arith.constant 4 : i32
    %3 = arith.muli %c4_i32, %arg1 : i32
    %c0_i32_1 = arith.constant 0 : i32
    %4 = arith.addi %3, %c0_i32_1 : i32
    %5 = arith.index_cast %4 : i32 to index
    %6 = memref.load %arg2[%5] : memref<32xf32, #tpu.memory_space<smem>>
    %c1_i32 = arith.constant 1 : i32
    %7 = arith.addi %3, %c1_i32 : i32
    %8 = arith.index_cast %7 : i32 to index
    %9 = memref.load %arg2[%8] : memref<32xf32, #tpu.memory_space<smem>>
    %c2_i32 = arith.constant 2 : i32
    %10 = arith.addi %3, %c2_i32 : i32
    %11 = arith.index_cast %10 : i32 to index
    %12 = memref.load %arg2[%11] : memref<32xf32, #tpu.memory_space<smem>>
    %c3_i32 = arith.constant 3 : i32
    %13 = arith.addi %3, %c3_i32 : i32
    %14 = arith.index_cast %13 : i32 to index
    %15 = memref.load %arg2[%14] : memref<32xf32, #tpu.memory_space<smem>>
    %c0 = arith.constant 0 : index
    %c0_2 = arith.constant 0 : index
    %c0_3 = arith.constant 0 : index
    %16 = vector.load %arg11[%c0, %c0_2, %c0_3] : memref<1x8x128xf32, #tpu.memory_space<vmem>>, vector<1x8x128xf32>
    %17 = vector.shape_cast %16 : vector<1x8x128xf32> to vector<8x128xf32>
    %c0_4 = arith.constant 0 : index
    %c0_5 = arith.constant 0 : index
    %18 = vector.load %arg6[%c0_4, %c0_5] : memref<64x8xf32, #tpu.memory_space<vmem>>, vector<64x8xf32>
    %cst = arith.constant dense<0.000000e+00> : vector<64x128xf32>
    %19 = tpu.matmul %18, %17, %cst {dimension_numbers = #tpu.dot_dimension_numbers<[1], [0], [0], [1], [0, 0, 1, 1], [], []>} : vector<64x8xf32>, vector<8x128xf32>, vector<64x128xf32> -> vector<64x128xf32>
    %c0_6 = arith.constant 0 : index
    %c0_7 = arith.constant 0 : index
    %c0_8 = arith.constant 0 : index
    %20 = vector.load %arg8[%c0_6, %c0_7, %c0_8] : memref<1x64x1xf32, #tpu.memory_space<vmem>>, vector<1x64x1xf32>
    %21 = vector.shape_cast %20 : vector<1x64x1xf32> to vector<64x1xf32>
    %22 = vector.broadcast %21 : vector<64x1xf32> to vector<64x128xf32>
    %23 = arith.addf %19, %22 : vector<64x128xf32>
    %c0_9 = arith.constant 0 : index
    %c0_10 = arith.constant 0 : index
    %24 = vector.load %arg9[%c0_9, %c0_10] : memref<64x1xf32, #tpu.memory_space<vmem>>, vector<64x1xf32>
    %25 = vector.broadcast %15 : f32 to vector<64x1xf32>
    %26 = arith.mulf %25, %24 : vector<64x1xf32>
    %27 = vector.broadcast %26 : vector<64x1xf32> to vector<64x128xf32>
    %28 = arith.addf %23, %27 : vector<64x128xf32>
    %29 = math.tanh %28 : vector<64x128xf32>
    %c0_11 = arith.constant 0 : index
    %c0_12 = arith.constant 0 : index
    %30 = vector.load %arg7[%c0_11, %c0_12] : memref<8x64xf32, #tpu.memory_space<vmem>>, vector<8x64xf32>
    %cst_13 = arith.constant dense<0.000000e+00> : vector<8x128xf32>
    %31 = tpu.matmul %30, %29, %cst_13 {dimension_numbers = #tpu.dot_dimension_numbers<[1], [0], [0], [1], [0, 0, 1, 1], [], []>} : vector<8x64xf32>, vector<64x128xf32>, vector<8x128xf32> -> vector<8x128xf32>
    %c0_14 = arith.constant 0 : index
    %c0_15 = arith.constant 0 : index
    %32 = vector.load %arg10[%c0_14, %c0_15] : memref<8x1xf32, #tpu.memory_space<vmem>>, vector<8x1xf32>
    %33 = vector.broadcast %32 : vector<8x1xf32> to vector<8x128xf32>
    %34 = arith.addf %31, %33 : vector<8x128xf32>
    %35 = vector.broadcast %9 : f32 to vector<8x128xf32>
    %36 = arith.mulf %35, %34 : vector<8x128xf32>
    %37 = arith.subf %17, %36 : vector<8x128xf32>
    %38 = vector.broadcast %6 : f32 to vector<8x128xf32>
    %39 = arith.mulf %37, %38 : vector<8x128xf32>
    %c0_16 = arith.constant 0 : index
    %c0_17 = arith.constant 0 : index
    %c0_18 = arith.constant 0 : index
    %c0_19 = arith.constant 0 : index
    %40 = vector.load %arg5[%c0_16, %c0_17, %c0_18, %c0_19] : memref<1x1x8x128xbf16, #tpu.memory_space<vmem>>, vector<1x1x8x128xbf16>
    %41 = vector.shape_cast %40 : vector<1x1x8x128xbf16> to vector<8x128xbf16>
    %42 = arith.extf %41 : vector<8x128xbf16> to vector<8x128xf32>
    %43 = vector.broadcast %12 : f32 to vector<8x128xf32>
    %44 = arith.mulf %43, %42 : vector<8x128xf32>
    %45 = arith.addf %39, %44 : vector<8x128xf32>
    %c0_20 = arith.constant 0 : index
    %c0_21 = arith.constant 0 : index
    %c0_22 = arith.constant 0 : index
    %46 = vector.load %arg4[%c0_20, %c0_21, %c0_22] : memref<1x1x128xf32, #tpu.memory_space<vmem>>, vector<1x1x128xf32>
    %47 = vector.shape_cast %46 : vector<1x1x128xf32> to vector<1x128xf32>
    %48 = vector.broadcast %47 : vector<1x128xf32> to vector<8x128xf32>
    %49 = arith.mulf %45, %48 : vector<8x128xf32>
    %c0_23 = arith.constant 0 : index
    %c0_24 = arith.constant 0 : index
    %c0_25 = arith.constant 0 : index
    %50 = vector.load %arg11[%c0_23, %c0_24, %c0_25] : memref<1x8x128xf32, #tpu.memory_space<vmem>>, vector<1x8x128xf32>
    %51 = vector.shape_cast %50 : vector<1x8x128xf32> to vector<8x128xf32>
    %52 = vector.shape_cast %49 : vector<8x128xf32> to vector<1x8x128xf32>
    tpu.vector_store %arg11[%c0_23, %c0_24, %c0_25], %52 {strides = array<i32>} : memref<1x8x128xf32, #tpu.memory_space<vmem>>, vector<1x8x128xf32>,
    return
  }
  func.func @transform_0(%arg0: i32, %arg1: i32) -> i32 {
    %c0_i32 = arith.constant 0 : i32
    %c0_i32_0 = arith.constant 0 : i32
    return %c0_i32 : i32
  }
  func.func @transform_1(%arg0: i32, %arg1: i32) -> (i32, i32, i32) {
    %c0_i32 = arith.constant 0 : i32
    %c0_i32_0 = arith.constant 0 : i32
    %c0_i32_1 = arith.constant 0 : i32
    return %arg0, %c0_i32, %c0_i32_0 : i32, i32, i32
  }
  func.func @transform_2(%arg0: i32, %arg1: i32) -> (i32, i32, i32) {
    %c0_i32 = arith.constant 0 : i32
    %c0_i32_0 = arith.constant 0 : i32
    %c0_i32_1 = arith.constant 0 : i32
    return %arg0, %c0_i32, %c0_i32_0 : i32, i32, i32
  }
  func.func @transform_3(%arg0: i32, %arg1: i32) -> (i32, i32, i32, i32) {
    %c0_i32 = arith.constant 0 : i32
    %c0_i32_0 = arith.constant 0 : i32
    %c0_i32_1 = arith.constant 0 : i32
    return %arg1, %arg0, %c0_i32, %c0_i32_0 : i32, i32, i32, i32
  }
  func.func @transform_4(%arg0: i32, %arg1: i32) -> (i32, i32) {
    %c0_i32 = arith.constant 0 : i32
    %c0_i32_0 = arith.constant 0 : i32
    %c0_i32_1 = arith.constant 0 : i32
    return %c0_i32, %c0_i32_0 : i32, i32
  }
  func.func @transform_5(%arg0: i32, %arg1: i32) -> (i32, i32) {
    %c0_i32 = arith.constant 0 : i32
    %c0_i32_0 = arith.constant 0 : i32
    %c0_i32_1 = arith.constant 0 : i32
    return %c0_i32, %c0_i32_0 : i32, i32
  }
  func.func @transform_6(%arg0: i32, %arg1: i32) -> (i32, i32, i32) {
    %c0_i32 = arith.constant 0 : i32
    %c0_i32_0 = arith.constant 0 : i32
    %c0_i32_1 = arith.constant 0 : i32
    return %arg0, %c0_i32, %c0_i32_0 : i32, i32, i32
  }
  func.func @transform_7(%arg0: i32, %arg1: i32) -> (i32, i32) {
    %c0_i32 = arith.constant 0 : i32
    %c0_i32_0 = arith.constant 0 : i32
    %c0_i32_1 = arith.constant 0 : i32
    return %c0_i32, %c0_i32_0 : i32, i32
  }
  func.func @transform_8(%arg0: i32, %arg1: i32) -> (i32, i32) {
    %c0_i32 = arith.constant 0 : i32
    %c0_i32_0 = arith.constant 0 : i32
    %c0_i32_1 = arith.constant 0 : i32
    return %c0_i32, %c0_i32_0 : i32, i32
  }
  func.func @transform_9(%arg0: i32, %arg1: i32) -> (i32, i32, i32) {
    %c0_i32 = arith.constant 0 : i32
    %c0_i32_0 = arith.constant 0 : i32
    %c0_i32_1 = arith.constant 0 : i32
    return %arg0, %c0_i32, %c0_i32_0 : i32, i32, i32
  }
}

</mosaic_0001>

<bundles_post_ra>
// kernel: token_diffusion_reverse.1
= control target key start
LH: loop header
LB: loop body
LE: loop exit
PB: predicated region body
PF: predicated region fallthrough
CT: control target
= control target key end

     0   :  { %s1355_s0 = inlined_call_operand.vmem [shape: f32[32], index: 0, kind: input, shape index: {}]   ;;  %s1356_s1 = inlined_call_operand.vmem [shape: f32[2,8,128], index: 1, kind: input, shape index: {}]   ;;  %s1357_s2 = inlined_call_operand.vmem [shape: f32[2,1,128], index: 2, kind: input, shape index: {}]   ;;  %s1358_s3 = inlined_call_operand.vmem [shape: bf16[8,2,8,128], index: 3, kind: input, shape index: {}]   ;;  %s1359_s4 = inlined_call_operand.vmem [shape: f32[64,8], index: 4, kind: input, shape index: {}]   ;;  %s1360_s5 = inlined_call_operand.vmem [shape: f32[8,64], index: 5, kind: input, shape index: {}]   ;;  %s1361_s6 = inlined_call_operand.vmem [shape: f32[2,64,1], index: 6, kind: input, shape index: {}]   ;;  %s1362_s7 = inlined_call_operand.vmem [shape: f32[64,1], index: 7, kind: input, shape index: {}]   ;;  %s1363_s8 = inlined_call_operand.vmem [shape: f32[8,1], index: 8, kind: input, shape index: {}]   ;;  %s1364_s9 = inlined_call_operand.hbm [shape: f32[2,8,128], index: 9, kind: output, shape index: {}]  }
   0x1   :  { %1377 = sst [smem:[#allocation18_spill]] %s1355_s0 }
   0x2   :  { %1378 = sst [smem:[#allocation19_spill]] %s1364_s9 }
   0x3   :  { %14 = vsyncpa [#allocation4], 0 }
   0x4   :  { %15 = vsyncpa [#allocation3], 0 }
   0x5   :  { %17 = vsyncpa [#allocation3 + $0x1], 0  ;;  %s1114_s30 = smov 0   ;;  %s1116_s10 = smov 0  }
   0x6   :  { %s1118_s11 = smov 0   ;;  %s1120_s12 = smov 0  }
   0x7   :  { %s1122_s13 = smov 0   ;;  %s1124_s14 = smov 0  }
   0x8   :  { %s1126_s15 = smov 0   ;;  %s1128_s16 = smov 0  }
   0x9 LB: > { %1379 = sst [smem:[#allocation8_spill]] %s1032_s30  ;;  %s813_s17 = sadd.s32 4294967295, %s1060_s16   ;;  %s1060_s16 = sphi %s1128_s16, %s23_s16   ;;  %s1056_s15 = sphi %s1126_s15, %s1404_s15   ;;  %s1052_s14 = sphi %s1124_s14, %s1408_s14   ;;  %s1048_s13 = sphi %s1122_s13, %s1402_s13   ;;  %s1044_s12 = sphi %s1120_s12, %s1401_s12   ;;  %s1040_s11 = sphi %s1118_s11, %s1407_s11   ;;  %s1036_s10 = sphi %s1116_s10, %s1406_s10   ;;  %s1032_s30 = sphi %s1114_s30, %s1405_s30  }
   0xa   : > { %1380 = sst [smem:[#allocation9_spill]] %s1040_s11  ;;  %s814_s18 = sadd.s32 4294967294, %s1060_s16  }
   0xb   : > { %1381 = sst [smem:[#allocation10_spill]] %s1052_s14  ;;  %s32_s19 = sadd.s32 1, %s1052_s14 }
   0xc   : > { %1382 = sst [smem:[#allocation11_spill]] %s1056_s15  ;;  %s35_s20 = sadd.s32 1, %s1056_s15 }
   0xd   : > { %1383 = sst [smem:[#allocation12_spill]] %s1060_s16  ;;  %p33_p0 = scmp.ge.s32.totalorder %s32_s19, 8 }
   0xe   : > { %s253_s21 = sadd.s32 1, %s1040_s11  ;;  %p263_p1 = scmp.ne.s32.totalorder %s1040_s11, %s1036_s10 }
   0xf   : > { %p264_p2 = scmp.eq.s32.totalorder %s813_s17, 15  ;;  %s1410_s19 = smov (%p33_p0, %s32_s19), 0 }
  0x10   : > { %1384 = sst [smem:[#allocation13_spill]] %s1410_s19  ;;  %s1412_s20 = smov (!%p33_p0, %s35_s20), %s1056_s15 }
  0x11   : > { %p1164_p3 = por %p264_p2, %p263_p1  ;;  %p269_p4 = scmp.ne.s32.totalorder %s1036_s10, %s1032_s30 }
  0x12   : > { %p37_p5 = scmp.ge.s32.totalorder %s1412_s20, 2  ;;  %p270_p6 = scmp.eq.s32.totalorder %s814_s18, 15 }
  0x13   : > { %s1385_s22 = scalar_select %p1164_p3, 1, 0 }
  0x14   : > { %p815_p7 = scmp.ge.s32.totalorder %s1060_s16, 1  ;;  %p277_p8 = scmp.lt.s32.totalorder %s1060_s16, 17 }
  0x15   : > { %1386 = sst [smem:[#allocation14_spill]] %s1385_s22  ;;  %s1414_s20 = smov (%p37_p5, %s1412_s20), 0 }
  0x16   : > { %1387 = sst [smem:[#allocation15_spill]] %s1414_s20  ;;  %p1174_p9 = por %p270_p6, %p269_p4 }
  0x17   : > { %p278_p10 = pnand %p815_p7, %p277_p8  ;;  %s250_s24 = ssub.s32 %s1056_s15, %s1414_s20 }
  0x18   : > { %s1388_s23 = scalar_select %p1174_p9, 1, 0 }
  0x19   : > { %p251_p11 = scmp.eq.s32.totalorder %s250_s24, 0  ;;  %p850_p12 = pneg %p278_p10 }
  0x1a   : > { %1389 = sst [smem:[#allocation16_spill]] %s1388_s23  ;;  %p858_p13 = scmp.eq.s32.totalorder %s813_s17, 0 }
  0x1b   : > { %s1390_s0 = sld [smem:[#allocation18_spill]]  ;;  %s1062_s29 = smov [#allocation2]  }
  0x1c   : > { %s1184_s28 = scalar_select %p251_p11, %s1040_s11, %s253_s21  }
  0x1d   : > { %p851_p0 = pnand %p858_p13, %p850_p12 }
  0x1e   : > { %1391 = sst [smem:[#allocation17_spill]] %s1184_s28  ;;  %346 = sbr.rel (%p278_p10) target bundleno = 376 (0x178), region = 56 }
  0x21   : > { %s289_s27 = sshll.u32 %s1390_s0, 4  ;;  %s290_s27 = int_to_ptr.vmem [resolvable:$true] %s289_s27 }
  0x22   : > { %853 = dma.vmem_to_smem (!%p851_p0), %s290_s27, 16, %s1062_s29, [#allocation4]  }
  0x23   : > { %1023 = dma.done.wait (%p858_p13), [#allocation4], 16  }
  0x24   : > { %1025 = vsyncadd (%p858_p13), [#allocation4], 4294967280 }
  0x25   : > { %353 = sfence }
  0x26   : > { %s1368_s17 = sand.u32 1, %s1036_s10   ;;  %p399_p1 = scmp.lt.s32.totalorder %s1048_s13, 1 }
  0x27   : > { %s820_s18 = sshll.u32 %s1368_s17, 3  ;;  %p406_p2 = scmp.lt.s32.totalorder %s1044_s12, 7 }
  0x28   : > { %s1192_s21 = scalar_select %p399_p1, %s1048_s13, 1 }
  0x29   : > { %s407_s24 = scalar_select %p406_p2, %s1044_s12, 7 }
  0x2a   : > { %s821_s25 = sshll.u32 %s1192_s21, 3  ;;  %s405_s29 = scalar_lea.vmem %s1357_s2, %s1192_s21 }
  0x2b   : > { %s402_s19 = scalar_lea.vmem %s1356_s1, %s821_s25  ;;  %s822_s15 = sshll.u32 %s407_s24, 1 }
  0x2c   : > { %s411_s14 = sadd.s32 %s822_s15, %s1192_s21  ;;  %s841_s17 = sshll.u32 %s1192_s21, 6 }
  0x2d   : > { %s823_s28 = sshll.u32 %s411_s14, 2  ;;  %s1208_s30 = scalar_lea.vmem %s1361_s6, %s841_s17 }
  0x2e   : > { %s1213_s9 = scalar_lea.vmem %s1358_s3, %s823_s28  ;;  %s1215_s26 = scalar_lea.vmem [#allocation5], %s820_s18 }
  0x2f   : > { %p826_p4 = scmp.ne.s32.totalorder %s1044_s12, 0 }
  0x31   : > { %422 = sbr.rel (%p826_p4) target bundleno = 56 (0x38), region = 64 }
  0x36   : > { %v423_v0 = vld [vmem:[%s402_s19] sm:$0xff] }
  0x37   : > { %424 = vst [vmem:[%s1215_s26] sm:$0xff] %v423_v0 }
  0x38 PF: > { %v449_v2 = vld [vmem:[%s1208_s30 + $0x38] sm:$0xff]  ;;  %s1224_s0 = sshll.u32 %s1044_s12, 2  ;;  %v1063_v3 = vmov 0   ;;  %v434_v4 = vld [vmem:[%s1359_s4] sm:$0xff]  ;;  %vm490_vm0 = vcmask 64512   ;;  %v440_v6 = vld [vmem:[%s1359_s4 + $0x30] sm:$0xff] }
  0x39   : > { %927 = vset.pattern.permute.xlu0 %v1063_v3  ;;  %v437_v5 = vld [vmem:[%s1359_s4 + $0x18] sm:$0xff]  ;;  %s431_s19 = sadd.s32 3, %s1224_s0  ;;  %v447_v7 = vld [vmem:[%s1208_s30 + $0x28] sm:$0xff]  ;;  %928 = vset.pattern.permute.xlu1 %v1063_v3  ;;  %v446_v8 = vld [vmem:[%s1208_s30 + $0x20] sm:$0xff]  ;;  %vm636_vm1 = vcmask 523264   ;;  %s429_s23 = sadd.s32 2, %s1224_s0 }
  0x3a   : > { %s432_s22 = sld [smem:[#allocation2 + %s431_s19]]  ;;  %487 = vperm.xlu0 %927, %v449_v2   ;;  %477 = vperm.xlu1 %928, %v447_v7   ;;  %v563_v9 = vld [vmem:[%s1362_s7 + $0x38] sm:$0xff]  ;;  %v448_v10 = vld [vmem:[%s1208_s30 + $0x30] sm:$0xff]  ;;  %v435_v13 = vld [vmem:[%s1359_s4 + $0x8] sm:$0xff]  ;;  %s838_s24 = sshll.u32 %s1048_s13, 3 }
  0x3b   : > { %929 = vset.pattern.permute.xlu2 %v1063_v3  ;;  %v562_v12 = vld [vmem:[%s1362_s7 + $0x30] sm:$0xff]  ;;  %v438_v14 = vld [vmem:[%s1359_s4 + $0x20] sm:$0xff]  ;;  %v441_v16 = vld [vmem:[%s1359_s4 + $0x38] sm:$0xff]  ;;  %s430_s17 = sld [smem:[#allocation2 + %s429_s23]]  ;;  %s689_s16 = sshll.u32 %s1215_s26, 4  ;;  %s690_s16 = int_to_ptr.vmem [resolvable:$true] %s689_s16 }
  0x3c   : > { %472 = vperm.xlu2 %929, %v446_v8   ;;  %v561_v18 = vld [vmem:[%s1362_s7 + $0x28] sm:$0xff]  ;;  %v560_v20 = vld [vmem:[%s1362_s7 + $0x20] sm:$0xff]  ;;  %v436_v21 = vld [vmem:[%s1359_s4 + $0x10] sm:$0xff]  ;;  %s426_s18 = sld [smem:[#allocation2 + %s1224_s0]]  ;;  %s1395_s13 = sand.u32 1, %s1036_s10  }
  0x3d   : > { %v439_v22 = vld [vmem:[%s1359_s4 + $0x28] sm:$0xff]  ;;  %v445_v23 = vld [vmem:[%s1208_s30 + $0x18] sm:$0xff]  ;;  %v444_v26 = vld [vmem:[%s1208_s30 + $0x10] sm:$0xff]  ;;  %s1392_s11 = sld [smem:[#allocation19_spill]] }
  0x3e   : > { %v1220_v1 = vld [vmem:[%s1215_s26] sm:$0xff]  ;;  %v559_v25 = vld [vmem:[%s1362_s7 + $0x18] sm:$0xff]  ;;  %v558_v29 = vld [vmem:[%s1362_s7 + $0x10] sm:$0xff] }
  0x3f   : > { %530 = vmatpush.msra.mxu0 %v1220_v1  ;;  %842 = vmatpush.msra.mxu2 %v1220_v1  ;;  %v443_v28 = vld [vmem:[%s1208_s30 + $0x8] sm:$0xff]  ;;  %v442_v32 = vld [vmem:[%s1208_s30] sm:$0xff]  ;;  %s677_s30 = scalar_lea.sflag [#allocation3], %s1395_s13 }
  0x40   : > { %843 = vmatpush.msra.mxu3 %v1220_v1  ;;  %828 = vmatmul.msk.f32.vlgmr.msra.gmra.mxu0 %vm490_vm0, %v434_v4  ;;  %v564_v11 = vstv %s432_s22  ;;  %v557_v31 = vld [vmem:[%s1362_s7 + $0x8] sm:$0xff]  ;;  %v556_v34 = vld [vmem:[%s1362_s7] sm:$0xff]  ;;  %s427_s22 = sadd.s32 1, %s1224_s0 }
  0x41   : > { %831 = vmatmul.msk.f32.vlgmr.msra.gmra.mxu2 %vm490_vm0, %v437_v5  ;;  %834 = vmatmul.msk.f32.vlgmr.msra.gmra.mxu3 %vm490_vm0, %v440_v6  ;;  %v572_v15 = vmul.f32 %v564_v11, %v563_v9  ;;  %v571_v17 = vmul.f32 %v564_v11, %v562_v12  ;;  %v570_v19 = vmul.f32 %v564_v11, %v561_v18  ;;  %v630_v36 = vld [vmem:[%s1363_s8] sm:$0xff]  ;;  %s428_s28 = sld [smem:[#allocation2 + %s427_s22]] }
  0x42   : > { %482 = vperm.xlu0 %927, %v448_v10   ;;  %v569_v24 = vmul.f32 %v564_v11, %v560_v20  ;;  %v568_v27 = vmul.f32 %v564_v11, %v559_v25  ;;  %v567_v30 = vmul.f32 %v564_v11, %v558_v29  ;;  %v566_v33 = vmul.f32 %v564_v11, %v557_v31 }
  0x43   : > { %610 = vperm.xlu1 %928, %v572_v15   ;;  %v565_v35 = vmul.f32 %v564_v11, %v556_v34  ;;  %v667_v29 = vstv %s430_s17  ;;  %v663_v31 = vstv %s426_s18  ;;  %s1393_s19 = smov %s1392_s11  ;;  %s687_s14 = scalar_lea.hbm %s1392_s11, %s838_s24 }
  0x44   : > { %605 = vperm.xlu2 %929, %v571_v17   ;;  %s691_s12 = sshll.u32 %s687_s14, 4  ;;  %s982_s21 = scalar_lea.hbm %s1393_s19, 16  ;;  %s692_s12 = int_to_ptr.hbm [resolvable:$true] %s691_s12 }
  0x45   : > { %s976_s20 = sshra.s32 %s692_s12, 4  ;;  %s977_s20 = int_to_ptr.hbm [resolvable:$true] %s976_s20 }
  0x46   : > { %s978_s22 = scalar_lea.hbm %s977_s20, 8  ;;  %p983_p8 = scmp.lt.s32.totalorder %s977_s20, %s1393_s19 }
  0x47   : > { %p979_p5 = scmp.ne.s32.totalorder %s977_s20, %s978_s22  ;;  %p984_p10 = scmp.lt.s32.totalorder %s982_s21, %s978_s22 }
  0x48   : > { %829 = vmatmul.msk.f32.gmra.mxu0 %vm490_vm0, %v435_v13 }
  0x49   : > { %832 = vmatmul.msk.f32.gmra.mxu2 %vm490_vm0, %v438_v14  ;;  %835 = vmatmul.msk.f32.gmra.mxu3 %vm490_vm0, %v441_v16  ;;  %p980_p6 = pnand %p979_p5, %p1164_p3  ;;  %p985_p11 = por %p984_p10, %p983_p8 }
  0x4a   : > { %600 = vperm.xlu0 %927, %v570_v19  }
  0x4b   : > { %467 = vperm.xlu1 %928, %v445_v23   ;;  %v665_v23 = vld [vmem:[%s1213_s9] sm:$0xf]  ;;  %p981_p7 = pneg %p980_p6 }
  0x4c   : > { %595 = vperm.xlu2 %929, %v569_v24  }
  0x4d   : > { %p986_p12 = pnand %p985_p11, %p981_p7 }
  0x50   : > { %830 = vmatmul.msk.f32.gmra.mxu0 %vm490_vm0, %v436_v21  ;;  %v629_v21 = vld [vmem:[%s1360_s5] sm:$0xff] }
  0x51   : > { %833 = vmatmul.msk.f32.gmra.mxu2 %vm490_vm0, %v439_v22 }
  0x52   : > { %462 = vperm.xlu0 %927, %v444_v26   ;;  %v660_v26 = vstv %s428_s28 }
  0x53   : > { %590 = vperm.xlu1 %928, %v568_v27  }
  0x54   : > { %457 = vperm.xlu2 %929, %v443_v28   ;;  %v666_v28 = vunpack.c.l.bf16 %v665_v23 }
  0x5a   : > { %585 = vperm.xlu0 %927, %v567_v30  }
  0x5b   : > { %452 = vperm.xlu1 %928, %v442_v32  }
  0x5c   : > { %580 = vperm.xlu2 %929, %v566_v33   ;;  %v668_v33 = vmul.f32 %v667_v29, %v666_v28 }
  0x62   : > { %575 = vperm.xlu0 %927, %v565_v35   ;;  %v930_v35 = vld [vmem:[%s405_s29] ss:$0 sm:$0xff] }
  0x63   : > { %633 = vperm.xlu1 %928, %v630_v36  }
  0x96   : > { %v473_v38 = vpop.permute.xlu2 %472 }
  0x9e   : > { %v606_v42 = vpop.permute.xlu2 %605 }
  0xa6   : > { %v596_v48 = vpop.permute.xlu2 %595 }
  0xac   : > { %v488_v37 = vpop.permute.xlu0 %487  ;;  %v478_v39 = vpop.permute.xlu1 %477 }
  0xae   : > { %v458_v58 = vpop.permute.xlu2 %457 }
  0xb4   : > { %v483_v40 = vpop.permute.xlu0 %482 }
  0xb5   : > { %v611_v41 = vpop.permute.xlu1 %610 }
  0xb6   : > { %v581_v11 = vpop.permute.xlu2 %580 }
  0xbc   : > { %v601_v44 = vpop.permute.xlu0 %600 }
  0xbd   : > { %v532_v43 = vpop.f32.mrf.mxu0  ;;  %v468_v47 = vpop.permute.xlu1 %467 }
  0xc4   : > { %v541_v45 = vpop.f32.mrf.mxu2  ;;  %v550_v46 = vpop.f32.mrf.mxu3 }
  0xc5   : > { %v463_v49 = vpop.permute.xlu0 %462  ;;  %v551_v50 = vadd.f32 %v550_v46, %v483_v40  ;;  %v535_v51 = vpop.f32.mrf.mxu0  ;;  %v542_v0 = vadd.f32 %v541_v45, %v468_v47 }
  0xc6   : > { %v591_v56 = vpop.permute.xlu1 %590  ;;  %v536_v5 = vadd.f32 %v535_v51, %v458_v58 }
  0xc7   : > { %v619_v55 = vadd.f32 %v606_v42, %v551_v50  ;;  %v616_v6 = vadd.f32 %v591_v56, %v542_v0 }
  0xc8   : > { %v614_v13 = vadd.f32 %v581_v11, %v536_v5 }
  0xcc   : > { %v544_v52 = vpop.f32.mrf.mxu2  ;;  %v553_v53 = vpop.f32.mrf.mxu3 }
  0xcd   : > { %v554_v54 = vadd.f32 %v553_v53, %v488_v37  ;;  %v586_v59 = vpop.permute.xlu0 %585  ;;  %v545_v60 = vadd.f32 %v544_v52, %v473_v38  ;;  %v538_v63 = vpop.f32.mrf.mxu0 }
  0xce   : > { %v539_v7 = vadd.f32 %v538_v63, %v463_v49  ;;  %v453_v9 = vpop.permute.xlu1 %452 }
  0xcf   : > { %v620_v57 = vadd.f32 %v611_v41, %v554_v54  ;;  %v617_v2 = vadd.f32 %v596_v48, %v545_v60  ;;  %v533_v14 = vadd.f32 %v532_v43, %v453_v9 }
  0xd0   : > { %v615_v10 = vadd.f32 %v586_v59, %v539_v7 }
  0xd1   : > { %931 = vtanh.f32 %v620_v57 }
  0xd2   : > { %933 = vtanh.f32 %v619_v55 }
  0xd4   : > { %v547_v61 = vpop.f32.mrf.mxu2 }
  0xd5   : > { %v548_v62 = vadd.f32 %v547_v61, %v478_v39  ;;  %v576_v12 = vpop.permute.xlu0 %575 }
  0xd6   : > { %v613_v16 = vadd.f32 %v576_v12, %v533_v14  ;;  %v634_v24 = vpop.permute.xlu1 %633 }
  0xd7   : > { %v618_v3 = vadd.f32 %v601_v44, %v548_v62  ;;  %v932_v4 = vpop.eup %931 }
  0xd8   : > { %648 = vmatpush.msra.mxu1 %v932_v4  ;;  %v934_v8 = vpop.eup %933 }
  0xd9   : > { %935 = vtanh.f32 %v618_v3 }
  0xda   : > { %937 = vtanh.f32 %v617_v2  ;;  %649 = vmatpush.msra.mxu1 %v934_v8 }
  0xdb   : > { %939 = vtanh.f32 %v616_v6 }
  0xdc   : > { %941 = vtanh.f32 %v615_v10 }
  0xdd   : > { %943 = vtanh.f32 %v614_v13 }
  0xde   : > { %945 = vtanh.f32 %v613_v16 }
  0xdf   : > { %v936_v15 = vpop.eup %935 }
  0xe0   : > { %650 = vmatpush.msra.mxu1 %v936_v15  ;;  %v938_v17 = vpop.eup %937 }
  0xe1   : > { %v940_v18 = vpop.eup %939 }
  0xe2   : > { %651 = vmatpush.msra.mxu1 %v938_v17  ;;  %v942_v19 = vpop.eup %941 }
  0xe3   : > { %v944_v20 = vpop.eup %943 }
  0xe4   : > { %652 = vmatpush.msra.mxu1 %v940_v18  ;;  %v946_v22 = vpop.eup %945 }
  0xe6   : > { %653 = vmatpush.msra.mxu1 %v942_v19 }
  0xe8   : > { %654 = vmatpush.msra.mxu1 %v944_v20 }
  0xea   : > { %655 = vmatpush.msra.mxu1 %v946_v22 }
  0xeb   : > { %836 = vmatmul.msk.f32.vlgmr.msra.gmra.mxu1 %vm636_vm1, %v629_v21 }
 0x168   : > { %v657_v25 = vpop.f32.mrf.mxu1 }
 0x169   : > { %v658_v27 = vadd.f32 %v657_v25, %v634_v24 }
 0x16b   : > { %v661_v30 = vmul.f32 %v660_v26, %v658_v27 }
 0x16d   : > { %v662_v32 = vsub.f32 %v1220_v1, %v661_v30 }
 0x16f   : > { %v664_v34 = vmul.f32 %v663_v31, %v662_v32 }
 0x171   : > { %v669_v36 = vadd.f32 %v668_v33, %v664_v34 }
 0x173   : > { %v674_v37 = vmul.f32 %v930_v35, %v669_v36 }
 0x175   : > { %675 = vst [vmem:[%s1215_s26] sm:$0xff] %v674_v37 }
 0x176   : > { %989 = shalt.err (!%p986_p12)
}
 0x177   : > { %848 = dma.vmem_to_hbm [thread:$0]  (%p1164_p3), %s690_s16, 128, %s692_s12, %s677_s30  }
 0x178 PF: > { %s1396_s26 = sld [smem:[#allocation12_spill]] }
 0x179   : > { %s1397_s18 = sld [smem:[#allocation8_spill]] }
 0x17e   : > { %p860_p13 = scmp.ge.s32.totalorder %s1396_s26, 2 }
 0x17f   : > { %s703_s25 = sand.u32 1, %s1397_s18  }
 0x180   : > { %p855_p0 = pnand %p860_p13, %p1174_p9  ;;  %s704_s27 = scalar_lea.sflag [#allocation3], %s703_s25 }
 0x182   : > { %p856_p1 = pneg %p855_p0 }
 0x184   : > { %1027 = dma.done.wait (%p856_p1), %s704_s27, 128  }
 0x185   : > { %1029 = vsyncadd (%p856_p1), %s704_s27, 4294967168  ;;  %s23_s16 = sadd.s32 1, %s1396_s26   ;;  %s1399_s11 = sld [smem:[#allocation9_spill]] }
 0x186   : > { %p20_p2 = scmp.ge.s32.totalorder %s23_s16, 18   ;;  %s1400_s14 = sld [smem:[#allocation17_spill]] }
 0x187   : > { %s1401_s12 = sld [smem:[#allocation10_spill]]  ;;  %s1405_s30 = smov %s1036_s10 }
 0x188   : > { %s1402_s13 = sld [smem:[#allocation11_spill]] }
 0x189   : > { %s1403_s0 = sld [smem:[#allocation13_spill]] }
 0x18a   : > { %s1404_s15 = sld [smem:[#allocation15_spill]] }
 0x18b   : > { %s1406_s10 = smov %s1399_s11  ;;  %22 = sbr.rel (!%p20_p2) target bundleno = 9 (0x9), region = 109 }
 0x18c   : > { %s1407_s11 = smov %s1400_s14 }
 0x18f   : > { %s1408_s14 = smov %s1403_s0 }
 0x190   :  { %710 = vsyncpa [#allocation3], 1 }
 0x191   :  { %712 = vsyncpa [#allocation3 + $0x1], 1 }
 0x192   :  { %713 = vsyncpa [#allocation4], 1 }
 0x193   :  { %715 = vsyncpa [#allocation4 + $0x1], 1 }

</bundles_post_ra>
